<compile_context>
chip_gen: v5e
topology: v5e:2x2
jax: 0.10.0
libtpu: 0.0.40
codegen_flags: <defaults>
</compile_context>

<pallas_src>
import jax
import jax.numpy as jnp
from jax import lax
from jax.experimental import pallas as pl
from jax.experimental.pallas import tpu as pltpu


def _round_up(n, m):
    return ((n + m - 1) // m) * m


def _build_pixel_fn(a, b1, v):
    """Return f(x) = sum_c v[c]*relu(a[c]*x + b1[c]) as the cheapest exact VPU closed form.

      * all a>0 and all v*a>0 -> convex max-of-17-lines  (~49 VPU ops / vreg)
      * all a>0               -> folded hinge sum        (~64 VPU ops / vreg)
      * otherwise             -> direct hinge sum        (~80 VPU ops / vreg)
    Constants are Python floats so they lower to immediates (no SMEM plumbing).
    """
    a = [float(z) for z in a]
    b1 = [float(z) for z in b1]
    v = [float(z) for z in v]
    n = len(a)

    if all(ai > 0.0 for ai in a):
        w = [vi * ai for vi, ai in zip(v, a)]        # folded hinge weights
        t = [bi / ai for bi, ai in zip(b1, a)]       # relu(a*x+b) = a*relu(x + b/a), a > 0
        if all(wi > 0.0 for wi in w):
            # h(x) = sum_c w[c]*max(x + t[c], 0) is convex piecewise linear; its segment lines
            # (cumulative slopes/offsets sorted by breakpoint -t[c]) are supporting lines, so
            # h(x) = max(0, max_k A_k*x + B_k) exactly.
            order = sorted(range(n), key=lambda c: -t[c])   # ascending breakpoints
            A, B = [], []
            s_a = s_b = 0.0
            for c in order:
                s_a += w[c]
                s_b += w[c] * t[c]
                A.append(s_a)
                B.append(s_b)

            def pixel_fn(x):
                h = jnp.maximum(A[0] * x + B[0], 0.0)
                for k in range(1, n):
                    h = jnp.maximum(h, A[k] * x + B[k])
                return h

            return pixel_fn

        def pixel_fn(x):
            h = w[0] * jnp.maximum(x + t[0], 0.0)
            for c in range(1, n):
                h = h + w[c] * jnp.maximum(x + t[c], 0.0)
            return h

        return pixel_fn

    def pixel_fn(x):
        h = v[0] * jnp.maximum(a[0] * x + b1[0], 0.0)
        for c in range(1, n):
            h = h + v[c] * jnp.maximum(a[c] * x + b1[c], 0.0)
        return h

    return pixel_fn


def _make_kernel(pixel_fn):
    """conv1 -> relu -> (conv2∘conv3) -> fc on a (TN, 128) block of packed image pairs."""

    def kernel(x_ref, wf_ref, bf_ref, o_ref):
        h = pixel_fn(x_ref[...])                         # (TN, 128) pure VPU work
        # fc(64 -> 3) for both packed images at once: block-diagonal (128, 6) weight on the MXU.
        o_ref[...] = (
            jnp.dot(h, wf_ref[...], preferred_element_type=jnp.float32) + bf_ref[...]
        )

    return kernel


def make_params():
    i = jnp.arange(16, dtype=jnp.float32)
    w1 = (2.0 + i).reshape(1, 16)                                    # conv1, stored (in=1, out=16)
    b1 = jnp.full((1, 16), -2.0, jnp.float32)
    w2 = jnp.broadcast_to((2.0 + i).reshape(1, 16), (16, 16)).astype(jnp.float32)  # (in, out)
    b2 = jnp.full((1, 16), -2.0, jnp.float32)
    w3 = jnp.full((16, 1), 2.0, jnp.float32)                         # conv3, stored (in=16, out=1)
    b3 = jnp.full((1, 1), -2.0, jnp.float32)
    # fc: Linear(64, 3) with deterministic JAX uniform init (torch-style bound 1/sqrt(64)).
    k1, k2 = jax.random.split(jax.random.PRNGKey(0))
    bound = 1.0 / 8.0
    wf = jax.random.uniform(k1, (64, 3), jnp.float32, -bound, bound)  # == W.T of torch (3, 64)
    bf = jax.random.uniform(k2, (1, 3), jnp.float32, -bound, bound)
    return dict(w1=w1, b1=b1, w2=w2, b2=b2, w3=w3, b3=b3, wf=wf, bf=bf)


def disconnected_graph_forward(x_nchw, p, tile_rows=2048):
    N, C, H, W = x_nchw.shape
    assert C == 1 and H * W == 64, "input must be (N, 1, 8, 8) so that view(-1, 64) is valid"

    # ---- exact parameter folding (once, outside the kernel) ------------------------------
    a = p["w1"].reshape(16)                              # conv1 per-out-channel scale
    b1 = p["b1"].reshape(16)                             # conv1 bias
    v = (p["w2"] @ p["w3"]).reshape(16)                  # conv2∘conv3 folded channel weights
    c23 = float((p["b2"] @ p["w3"] + p["b3"]).reshape(()))  # folded conv2/conv3 bias (scalar)
    wf, bf = p["wf"], p["bf"]
    # block-diagonal fc weight / duplicated bias so one 128-lane row handles two images;
    # c23 folded into the fc bias:  (h + c23) @ W + b == h @ W + (b + c23 * colsum(W)).
    wf_big = jnp.zeros((128, 6), jnp.float32).at[:64, 0:3].set(wf).at[64:, 3:6].set(wf)
    bf_big = jnp.concatenate([bf, bf], axis=1) + c23 * jnp.sum(wf_big, axis=0, keepdims=True)

    # ---- input packing: NCHW (C==1) -> (N, 64) -> two images per 128-lane row ------------
    x64 = x_nchw.reshape(N, 64).astype(jnp.float32)      # C == 1: plain reshape, no transpose
    n_pad = N + (N % 2)
    if n_pad != N:
        x64 = jnp.concatenate([x64, jnp.zeros((1, 64), jnp.float32)], axis=0)
    np2 = n_pad // 2
    xp = x64.reshape(np2, 128)

    # rows per block: multiple of 8 sublanes, >= 2 grid steps when possible (v7x: 2 TCs),
    # capped at tile_rows (~1 MiB/block f32 input -> double-buffered VMEM stays tiny).
    tn = max(8, min(tile_rows, _round_up(pl.cdiv(np2, 2), 8)))
    grid = (pl.cdiv(np2, tn),)

    kernel = _make_kernel(_build_pixel_fn(a, b1, v))

    out_pairs = pl.pallas_call(
        kernel,
        out_shape=jax.ShapeDtypeStruct((np2, 6), jnp.float32),
        grid=grid,
        in_specs=[
            pl.BlockSpec((tn, 128), lambda i: (i, 0)),   # packed pixels (streamed blocks)
            pl.BlockSpec((128, 6), lambda i: (0, 0)),    # fc weight (VMEM-resident)
            pl.BlockSpec((1, 6), lambda i: (0, 0)),      # fc bias   (VMEM-resident)
        ],
        out_specs=pl.BlockSpec((tn, 6), lambda i: (i, 0)),
        compiler_params=pltpu.CompilerParams(dimension_semantics=("parallel",)),
    )(xp, wf_big, bf_big)

    # (np2, 6) -> (n_pad, 3) is a contiguous row split; drop the pad row if N was odd.
    return out_pairs.reshape(n_pad, 3)[:N]


def reference_forward(x_nchw, p):
    """Pure-JAX, op-by-op mirror of the torch module (un-fused)."""
    hi = lax.Precision.HIGHEST
    N = x_nchw.shape[0]
    x = x_nchw.reshape(-1, 1).astype(jnp.float32)                    # (N*64, 1) pixels, C_in = 1
    h = jnp.dot(x, p["w1"], precision=hi) + p["b1"]                  # conv1 (1x1)
    h = jnp.maximum(h, 0.0)                                          # relu
    h = jnp.dot(h, p["w2"], precision=hi) + p["b2"]                  # conv2 (1x1)
    h = jnp.dot(h, p["w3"], precision=hi) + p["b3"]                  # conv3 (1x1)
    h = h.reshape(N, 64)                                             # view(-1, 64)
    # fc left at default matmul precision so it uses the same MXU algorithm as the kernel's dot.
    return h @ p["wf"] + p["bf"]


if __name__ == "__main__":
    params = make_params()
    x = jax.random.normal(jax.random.PRNGKey(0), (2, 1, 8, 8), dtype=jnp.float32)

    out = jax.block_until_ready(disconnected_graph_forward(x, params))
    ref = reference_forward(x, params)

    assert out.shape == (2, 3)
    scale = float(jnp.max(jnp.abs(ref)))
    max_err = float(jnp.max(jnp.abs(out - ref)))
    assert max_err <= 5e-3 * scale + 1e-3, f"mismatch vs reference: max_err={max_err} scale={scale}"
    print("KERNEL_OK")
</pallas_src>

<mosaic_0001>
module attributes {stable_mosaic.version = 11 : i64} {
  func.func @kernel(%arg0: i32, %arg1: memref<8x128xf32, #tpu.memory_space<vmem>>, %arg2: memref<128x6xf32, #tpu.memory_space<vmem>>, %arg3: memref<1x6xf32, #tpu.memory_space<vmem>>, %arg4: memref<8x6xf32, #tpu.memory_space<vmem>>) attributes {dimension_semantics = [#tpu.dimension_semantics<parallel>], iteration_bounds = array<i64: 1>, scalar_prefetch = 0 : i64, scratch_operands = 0 : i64, tpu.core_type = #tpu.core_type<tc>, window_params = [{transform_indices = @transform_0, window_bounds = array<i64: 8, 128>}, {pipeline_mode = #tpu.pipeline_mode<synchronous>, transform_indices = @transform_1, window_bounds = array<i64: 128, 6>}, {pipeline_mode = #tpu.pipeline_mode<synchronous>, transform_indices = @transform_2, window_bounds = array<i64: 1, 6>}, {transform_indices = @transform_3, window_bounds = array<i64: 8, 6>}]} {
    %c0 = arith.constant 0 : index
    %c0_0 = arith.constant 0 : index
    %0 = vector.load %arg1[%c0, %c0_0] : memref<8x128xf32, #tpu.memory_space<vmem>>, vector<8x128xf32>
    %cst = arith.constant 5.168000e+03 : f32
    %1 = vector.broadcast %cst : f32 to vector<8x128xf32>
    %2 = arith.mulf %1, %0 : vector<8x128xf32>
    %cst_1 = arith.constant -6.080000e+02 : f32
    %3 = vector.broadcast %cst_1 : f32 to vector<8x128xf32>
    %4 = arith.addf %2, %3 : vector<8x128xf32>
    %cst_2 = arith.constant 0.000000e+00 : f32
    %5 = vector.broadcast %cst_2 : f32 to vector<8x128xf32>
    %6 = arith.maximumf %4, %5 : vector<8x128xf32>
    %cst_3 = arith.constant 1.003200e+04 : f32
    %7 = vector.broadcast %cst_3 : f32 to vector<8x128xf32>
    %8 = arith.mulf %7, %0 : vector<8x128xf32>
    %cst_4 = arith.constant -1.216000e+03 : f32
    %9 = vector.broadcast %cst_4 : f32 to vector<8x128xf32>
    %10 = arith.addf %8, %9 : vector<8x128xf32>
    %11 = arith.maximumf %6, %10 : vector<8x128xf32>
    %cst_5 = arith.constant 1.459200e+04 : f32
    %12 = vector.broadcast %cst_5 : f32 to vector<8x128xf32>
    %13 = arith.mulf %12, %0 : vector<8x128xf32>
    %cst_6 = arith.constant -1.824000e+03 : f32
    %14 = vector.broadcast %cst_6 : f32 to vector<8x128xf32>
    %15 = arith.addf %13, %14 : vector<8x128xf32>
    %16 = arith.maximumf %11, %15 : vector<8x128xf32>
    %cst_7 = arith.constant 1.884800e+04 : f32
    %17 = vector.broadcast %cst_7 : f32 to vector<8x128xf32>
    %18 = arith.mulf %17, %0 : vector<8x128xf32>
    %cst_8 = arith.constant -2.432000e+03 : f32
    %19 = vector.broadcast %cst_8 : f32 to vector<8x128xf32>
    %20 = arith.addf %18, %19 : vector<8x128xf32>
    %21 = arith.maximumf %16, %20 : vector<8x128xf32>
    %cst_9 = arith.constant 2.280000e+04 : f32
    %22 = vector.broadcast %cst_9 : f32 to vector<8x128xf32>
    %23 = arith.mulf %22, %0 : vector<8x128xf32>
    %cst_10 = arith.constant -3.040000e+03 : f32
    %24 = vector.broadcast %cst_10 : f32 to vector<8x128xf32>
    %25 = arith.addf %23, %24 : vector<8x128xf32>
    %26 = arith.maximumf %21, %25 : vector<8x128xf32>
    %cst_11 = arith.constant 2.644800e+04 : f32
    %27 = vector.broadcast %cst_11 : f32 to vector<8x128xf32>
    %28 = arith.mulf %27, %0 : vector<8x128xf32>
    %cst_12 = arith.constant -3.648000e+03 : f32
    %29 = vector.broadcast %cst_12 : f32 to vector<8x128xf32>
    %30 = arith.addf %28, %29 : vector<8x128xf32>
    %31 = arith.maximumf %26, %30 : vector<8x128xf32>
    %cst_13 = arith.constant 2.979200e+04 : f32
    %32 = vector.broadcast %cst_13 : f32 to vector<8x128xf32>
    %33 = arith.mulf %32, %0 : vector<8x128xf32>
    %cst_14 = arith.constant -4.256000e+03 : f32
    %34 = vector.broadcast %cst_14 : f32 to vector<8x128xf32>
    %35 = arith.addf %33, %34 : vector<8x128xf32>
    %36 = arith.maximumf %31, %35 : vector<8x128xf32>
    %cst_15 = arith.constant 3.283200e+04 : f32
    %37 = vector.broadcast %cst_15 : f32 to vector<8x128xf32>
    %38 = arith.mulf %37, %0 : vector<8x128xf32>
    %cst_16 = arith.constant -4.864000e+03 : f32
    %39 = vector.broadcast %cst_16 : f32 to vector<8x128xf32>
    %40 = arith.addf %38, %39 : vector<8x128xf32>
    %41 = arith.maximumf %36, %40 : vector<8x128xf32>
    %cst_17 = arith.constant 3.556800e+04 : f32
    %42 = vector.broadcast %cst_17 : f32 to vector<8x128xf32>
    %43 = arith.mulf %42, %0 : vector<8x128xf32>
    %cst_18 = arith.constant -5.472000e+03 : f32
    %44 = vector.broadcast %cst_18 : f32 to vector<8x128xf32>
    %45 = arith.addf %43, %44 : vector<8x128xf32>
    %46 = arith.maximumf %41, %45 : vector<8x128xf32>
    %cst_19 = arith.constant 3.800000e+04 : f32
    %47 = vector.broadcast %cst_19 : f32 to vector<8x128xf32>
    %48 = arith.mulf %47, %0 : vector<8x128xf32>
    %cst_20 = arith.constant -6.080000e+03 : f32
    %49 = vector.broadcast %cst_20 : f32 to vector<8x128xf32>
    %50 = arith.addf %48, %49 : vector<8x128xf32>
    %51 = arith.maximumf %46, %50 : vector<8x128xf32>
    %cst_21 = arith.constant 4.012800e+04 : f32
    %52 = vector.broadcast %cst_21 : f32 to vector<8x128xf32>
    %53 = arith.mulf %52, %0 : vector<8x128xf32>
    %cst_22 = arith.constant -6.688000e+03 : f32
    %54 = vector.broadcast %cst_22 : f32 to vector<8x128xf32>
    %55 = arith.addf %53, %54 : vector<8x128xf32>
    %56 = arith.maximumf %51, %55 : vector<8x128xf32>
    %cst_23 = arith.constant 4.195200e+04 : f32
    %57 = vector.broadcast %cst_23 : f32 to vector<8x128xf32>
    %58 = arith.mulf %57, %0 : vector<8x128xf32>
    %cst_24 = arith.constant -7.296000e+03 : f32
    %59 = vector.broadcast %cst_24 : f32 to vector<8x128xf32>
    %60 = arith.addf %58, %59 : vector<8x128xf32>
    %61 = arith.maximumf %56, %60 : vector<8x128xf32>
    %cst_25 = arith.constant 4.347200e+04 : f32
    %62 = vector.broadcast %cst_25 : f32 to vector<8x128xf32>
    %63 = arith.mulf %62, %0 : vector<8x128xf32>
    %cst_26 = arith.constant -7.904000e+03 : f32
    %64 = vector.broadcast %cst_26 : f32 to vector<8x128xf32>
    %65 = arith.addf %63, %64 : vector<8x128xf32>
    %66 = arith.maximumf %61, %65 : vector<8x128xf32>
    %cst_27 = arith.constant 4.468800e+04 : f32
    %67 = vector.broadcast %cst_27 : f32 to vector<8x128xf32>
    %68 = arith.mulf %67, %0 : vector<8x128xf32>
    %cst_28 = arith.constant -8.512000e+03 : f32
    %69 = vector.broadcast %cst_28 : f32 to vector<8x128xf32>
    %70 = arith.addf %68, %69 : vector<8x128xf32>
    %71 = arith.maximumf %66, %70 : vector<8x128xf32>
    %cst_29 = arith.constant 4.560000e+04 : f32
    %72 = vector.broadcast %cst_29 : f32 to vector<8x128xf32>
    %73 = arith.mulf %72, %0 : vector<8x128xf32>
    %cst_30 = arith.constant -9.120000e+03 : f32
    %74 = vector.broadcast %cst_30 : f32 to vector<8x128xf32>
    %75 = arith.addf %73, %74 : vector<8x128xf32>
    %76 = arith.maximumf %71, %75 : vector<8x128xf32>
    %cst_31 = arith.constant 4.620800e+04 : f32
    %77 = vector.broadcast %cst_31 : f32 to vector<8x128xf32>
    %78 = arith.mulf %77, %0 : vector<8x128xf32>
    %cst_32 = arith.constant -9.728000e+03 : f32
    %79 = vector.broadcast %cst_32 : f32 to vector<8x128xf32>
    %80 = arith.addf %78, %79 : vector<8x128xf32>
    %81 = arith.maximumf %76, %80 : vector<8x128xf32>
    %c0_33 = arith.constant 0 : index
    %c0_34 = arith.constant 0 : index
    %82 = vector.load %arg2[%c0_33, %c0_34] : memref<128x6xf32, #tpu.memory_space<vmem>>, vector<128x6xf32>
    %cst_35 = arith.constant dense<0.000000e+00> : vector<8x6xf32>
    %83 = tpu.matmul %81, %82, %cst_35 {dimension_numbers = #tpu.dot_dimension_numbers<[1], [0], [0], [1], [0, 0, 1, 1], [], []>} : vector<8x128xf32>, vector<128x6xf32>, vector<8x6xf32> -> vector<8x6xf32>
    %c0_36 = arith.constant 0 : index
    %c0_37 = arith.constant 0 : index
    %84 = vector.load %arg3[%c0_36, %c0_37] : memref<1x6xf32, #tpu.memory_space<vmem>>, vector<1x6xf32>
    %85 = vector.broadcast %84 : vector<1x6xf32> to vector<8x6xf32>
    %86 = arith.addf %83, %85 : vector<8x6xf32>
    %c0_38 = arith.constant 0 : index
    %c0_39 = arith.constant 0 : index
    %87 = vector.load %arg4[%c0_38, %c0_39] : memref<8x6xf32, #tpu.memory_space<vmem>>, vector<8x6xf32>
    tpu.vector_store %arg4[%c0_38, %c0_39], %86 {strides = array<i32>} : memref<8x6xf32, #tpu.memory_space<vmem>>, vector<8x6xf32>,
    return
  }
  func.func @transform_0(%arg0: i32) -> (i32, i32) {
    %c0_i32 = arith.constant 0 : i32
    %c0_i32_0 = arith.constant 0 : i32
    return %arg0, %c0_i32 : i32, i32
  }
  func.func @transform_1(%arg0: i32) -> (i32, i32) {
    %c0_i32 = arith.constant 0 : i32
    %c0_i32_0 = arith.constant 0 : i32
    %c0_i32_1 = arith.constant 0 : i32
    return %c0_i32, %c0_i32_0 : i32, i32
  }
  func.func @transform_2(%arg0: i32) -> (i32, i32) {
    %c0_i32 = arith.constant 0 : i32
    %c0_i32_0 = arith.constant 0 : i32
    %c0_i32_1 = arith.constant 0 : i32
    return %c0_i32, %c0_i32_0 : i32, i32
  }
  func.func @transform_3(%arg0: i32) -> (i32, i32) {
    %c0_i32 = arith.constant 0 : i32
    %c0_i32_0 = arith.constant 0 : i32
    return %arg0, %c0_i32 : i32, i32
  }
}

</mosaic_0001>

<bundles_post_ra>
// kernel: tpu_custom_call.1
= control target key start
LH: loop header
LB: loop body
LE: loop exit
PB: predicated region body
PF: predicated region fallthrough
CT: control target
= control target key end

     0   :  { %8 = vsyncpa [#allocation3], 0  ;;  %vm104_vm0 = vcmask 48128   ;;  %s252_s0 = inlined_call_operand.vmem [shape: f32[1,128], index: 0, kind: input, shape index: {}]   ;;  %s253_s1 = inlined_call_operand.vmem [shape: f32[128,6], index: 1, kind: input, shape index: {}]   ;;  %s254_s2 = inlined_call_operand.vmem [shape: f32[1,6], index: 2, kind: input, shape index: {}]   ;;  %s255_s3 = inlined_call_operand.hbm [shape: f32[1,6], index: 3, kind: output, shape index: {}]  }
   0x1   :  { %v79_v0 = vld [vmem:[%s253_s1 + $0x78] sm:$0xff]  ;;  %v78_v1 = vld [vmem:[%s253_s1 + $0x70] sm:$0xff]  ;;  %v77_v2 = vld [vmem:[%s253_s1 + $0x68] sm:$0xff] }
   0x2   :  { %84 = vmatpush.msra.mxu0 %v79_v0  ;;  %v76_v3 = vld [vmem:[%s253_s1 + $0x60] sm:$0xff]  ;;  %v75_v5 = vld [vmem:[%s253_s1 + $0x58] sm:$0xff]  ;;  %v74_v9 = vld [vmem:[%s253_s1 + $0x50] sm:$0xff] }
   0x3   :  { %v192_v4 = vld [vmem:[%s252_s0] sm:$0xff]  ;;  %v73_v13 = vld [vmem:[%s253_s1 + $0x48] sm:$0xff]  ;;  %v71_v21 = vld [vmem:[%s253_s1 + $0x38] sm:$0xff] }
   0x4   :  { %85 = vmatpush.msra.mxu0 %v78_v1  ;;  %v16_v6 = vmul.f32 5168.0, %v192_v4  ;;  %v19_v7 = vmul.f32 10032.0, %v192_v4  ;;  %v22_v8 = vmul.f32 14592.0, %v192_v4  ;;  %v25_v12 = vmul.f32 18848.0, %v192_v4  ;;  %v72_v17 = vld [vmem:[%s253_s1 + $0x40] sm:$0xff]  ;;  %v70_v25 = vld [vmem:[%s253_s1 + $0x30] sm:$0xff] }
   0x5   :  { %v28_v16 = vmul.f32 22800.0, %v192_v4  ;;  %v31_v20 = vmul.f32 26448.0, %v192_v4  ;;  %v34_v24 = vmul.f32 29792.0, %v192_v4  ;;  %v37_v28 = vmul.f32 32832.0, %v192_v4  ;;  %v69_v29 = vld [vmem:[%s253_s1 + $0x28] sm:$0xff]  ;;  %v68_v33 = vld [vmem:[%s253_s1 + $0x20] sm:$0xff] }
   0x6   :  { %86 = vmatpush.msra.mxu0 %v77_v2  ;;  %v17_v10 = vadd.f32 -608.0, %v16_v6  ;;  %v20_v11 = vadd.f32 -1216.0, %v19_v7  ;;  %v23_v15 = vadd.f32 -1824.0, %v22_v8  ;;  %v26_v19 = vadd.f32 -2432.0, %v25_v12  ;;  %v67_v37 = vld [vmem:[%s253_s1 + $0x18] sm:$0xff]  ;;  %v66_v41 = vld [vmem:[%s253_s1 + $0x10] sm:$0xff] }
   0x7   :  { %v29_v23 = vadd.f32 -3040.0, %v28_v16  ;;  %v32_v27 = vadd.f32 -3648.0, %v31_v20  ;;  %v35_v31 = vadd.f32 -4256.0, %v34_v24  ;;  %v40_v32 = vmul.f32 35568.0, %v192_v4  ;;  %v65_v45 = vld [vmem:[%s253_s1 + $0x8] sm:$0xff]  ;;  %v64_v49 = vld [vmem:[%s253_s1] sm:$0xff] }
   0x8   :  { %87 = vmatpush.msra.mxu0 %v76_v3  ;;  %v18_v14 = vmax.f32 %v17_v10, 0.0  ;;  %v38_v35 = vadd.f32 -4864.0, %v37_v28  ;;  %v43_v36 = vmul.f32 38000.0, %v192_v4  ;;  %v46_v40 = vmul.f32 40128.0, %v192_v4  ;;  %v127_v1 = vld [vmem:[%s254_s2] ss:$0 sm:$0xff] }
   0x9   :  { %v41_v39 = vadd.f32 -5472.0, %v40_v32  ;;  %v49_v44 = vmul.f32 41952.0, %v192_v4  ;;  %v52_v48 = vmul.f32 43472.0, %v192_v4  ;;  %v55_v52 = vmul.f32 44688.0, %v192_v4 }
   0xa   :  { %88 = vmatpush.msra.mxu0 %v75_v5  ;;  %v21_v18 = vmax.f32 %v18_v14, %v20_v11  ;;  %v44_v43 = vadd.f32 -6080.0, %v43_v36  ;;  %v47_v47 = vadd.f32 -6688.0, %v46_v40  ;;  %v58_v55 = vmul.f32 45600.0, %v192_v4 }
   0xb   :  { %v50_v51 = vadd.f32 -7296.0, %v49_v44  ;;  %v53_v54 = vadd.f32 -7904.0, %v52_v48  ;;  %v56_v57 = vadd.f32 -8512.0, %v55_v52  ;;  %v61_v58 = vmul.f32 46208.0, %v192_v4 }
   0xc   :  { %89 = vmatpush.msra.mxu0 %v74_v9  ;;  %v24_v22 = vmax.f32 %v21_v18, %v23_v15  ;;  %v59_v60 = vadd.f32 -9120.0, %v58_v55 }
   0xd   :  { %v62_v62 = vadd.f32 -9728.0, %v61_v58 }
   0xe   :  { %90 = vmatpush.msra.mxu0 %v73_v13  ;;  %v27_v26 = vmax.f32 %v24_v22, %v26_v19 }
  0x10   :  { %91 = vmatpush.msra.mxu0 %v72_v17  ;;  %v30_v30 = vmax.f32 %v27_v26, %v29_v23 }
  0x12   :  { %92 = vmatpush.msra.mxu0 %v71_v21  ;;  %v33_v34 = vmax.f32 %v30_v30, %v32_v27 }
  0x14   :  { %93 = vmatpush.msra.mxu0 %v70_v25  ;;  %v36_v38 = vmax.f32 %v33_v34, %v35_v31 }
  0x16   :  { %94 = vmatpush.msra.mxu0 %v69_v29  ;;  %v39_v42 = vmax.f32 %v36_v38, %v38_v35 }
  0x18   :  { %95 = vmatpush.msra.mxu0 %v68_v33  ;;  %v42_v46 = vmax.f32 %v39_v42, %v41_v39 }
  0x1a   :  { %96 = vmatpush.msra.mxu0 %v67_v37  ;;  %v45_v50 = vmax.f32 %v42_v46, %v44_v43 }
  0x1c   :  { %97 = vmatpush.msra.mxu0 %v66_v41  ;;  %v48_v53 = vmax.f32 %v45_v50, %v47_v47 }
  0x1e   :  { %98 = vmatpush.msra.mxu0 %v65_v45  ;;  %v51_v56 = vmax.f32 %v48_v53, %v50_v51 }
  0x20   :  { %99 = vmatpush.msra.mxu0 %v64_v49  ;;  %v54_v59 = vmax.f32 %v51_v56, %v53_v54 }
  0x22   :  { %v57_v61 = vmax.f32 %v54_v59, %v56_v57 }
  0x24   :  { %v60_v63 = vmax.f32 %v57_v61, %v59_v60 }
  0x26   :  { %v63_v0 = vmax.f32 %v60_v63, %v62_v62 }
  0x28   :  { %100 = vmatmul.f32.vlgmr.msra.gmra.mxu0 %v63_v0 }
  0xa5   :  { %v101_v2 = vpop.f32.mrf.mxu0 }
  0xa6   :  { %v102_v3 = vadd.f32 %v127_v1, %v101_v2 }
  0xa8   :  { %105 = vst.msk [vmem:[#allocation2] sm:$0xff] %vm104_vm0, %v102_v3 }
  0xa9   :  { %109 = vsyncadd [#allocation3], 112  ;;  %s112_s21 = sshll.u32 %s255_s3, 4  ;;  %s154_s22 = smov [#allocation2]   ;;  %s113_s21 = int_to_ptr.hbm [resolvable:$true] %s112_s21 }
  0xaa   :  { %s110_s23 = sshll.u32 %s154_s22, 4  ;;  %s155_s24 = smov 16   ;;  %s111_s23 = int_to_ptr.vmem [resolvable:$true] %s110_s23 }
  0xab   :  { %s156_s25 = smov 1  }
  0xac   :  { %118 = dma.vmem_to_hbm [thread:$0]  %s111_s23, 16, %s113_s21, [#allocation3], %s155_s24, %s155_s24, %s156_s25  }
  0xad   :  { %152 = dma.done.wait [#allocation3], 128  }
  0xae   :  { %153 = vsyncadd [#allocation3], 4294967168 }
  0xaf   :  { %123 = vsyncpa [#allocation3], 1 }

</bundles_post_ra>
